<compile_context>
chip_gen: v7x
topology: tpu7x:2x2x1
jax: 0.10.0
libtpu: 0.0.40
codegen_flags: <defaults>
</compile_context>

<pallas_src>
import functools
import math

import jax
import jax.numpy as jnp
from jax.experimental import pallas as pl
from jax.experimental.pallas import tpu as pltpu


# Conservative VMEM budget so the same tiling works on v7x (64 MiB physical,
# 32 MiB default scoped) as well as v5e/v6e (128 MiB physical).
_VMEM_BUDGET_BYTES = 24 * 1024 * 1024
# Explicit scoped-VMEM limit: raises v5e's 16 MiB default, stays well under
# v7x's 64 MiB physical VMEM.
_VMEM_LIMIT_BYTES = 40 * 1024 * 1024


def _leaky_relu(x, slope=0.2):
    return jnp.where(x > 0, x, slope * x)


def _choose_tile_n(out_dim, nfeature, w3_itemsize=2, bsize_hint=8):
    """Largest output-column tile (multiple of 128 dividing out_dim) that fits
    the VMEM budget.  Small problems collapse to a single grid step."""
    # Per output column: double-buffered W3 tile + b3 tile (f32) + out tile (f32).
    bytes_per_col = 2 * nfeature * w3_itemsize + 2 * 4 + 2 * bsize_hint * 4
    max_cols = max(128, _VMEM_BUDGET_BYTES // bytes_per_col)
    if out_dim <= max_cols or out_dim % 128 != 0:
        # Single-step fast path (also covers non-128-aligned out_dim, where the
        # block must equal the full array dim anyway).
        return out_dim
    n128 = out_dim // 128
    best = 128
    for d in range(1, n128 + 1):
        cand = d * 128
        if n128 % d == 0 and cand <= max_cols:
            best = cand
    return best


def prepare_params(params, *, n_steps, nfeature, h_height, h_width,
                   weight_dtype=jnp.bfloat16):
    """One-time (outside the jitted forward) weight preparation:
    cast W3 to bf16 and re-layout to (n_tiles, nfeature, tile_n) so each grid
    step's W3 DMA is one contiguous HBM block."""
    w1, b1, w2, b2, w3, b3 = params
    out_dim = n_steps * nfeature * h_height * h_width
    assert w3.shape == (nfeature, out_dim), w3.shape
    tile_n = _choose_tile_n(out_dim, nfeature,
                            w3_itemsize=jnp.dtype(weight_dtype).itemsize)
    n_tiles = out_dim // tile_n
    w3_t = (w3.reshape(nfeature, n_tiles, tile_n)
              .transpose(1, 0, 2)                       # (n_tiles, nfeature, tile_n)
              .astype(weight_dtype))
    b3_t = b3.reshape(n_tiles, 1, tile_n).astype(jnp.float32)
    return (w1, b1, w2, b2, w3_t, b3_t)


def _z_expander_proj_kernel(h_ref, w3_ref, b3_ref, out_ref):
    # One column tile of the final projection.  h is tiny and resident
    # (constant index_map); the bf16 W3 tile is the dominant HBM stream.
    # bf16 x bf16 on the MXU with f32 accumulation.
    out_ref[...] = (jnp.dot(h_ref[...], w3_ref[...],
                            preferred_element_type=jnp.float32)
                    + b3_ref[...]).astype(out_ref.dtype)


@functools.partial(jax.jit, static_argnames=("n_steps", "nfeature",
                                             "h_height", "h_width"))
def z_expander_forward(z, prepared, *, n_steps, nfeature, h_height, h_width):
    w1, b1, w2, b2, w3_t, b3_t = prepared
    bsize = z.shape[0]
    n_tiles, nf, tile_n = w3_t.shape
    assert nf == nfeature
    out_dim = n_tiles * tile_n
    assert out_dim == n_steps * nfeature * h_height * h_width

    # Hidden MLP hoisted out of the Pallas kernel (microseconds of work at
    # M = bsize); computed in f32, then cast once to bf16 for the MXU.
    h = _leaky_relu(z @ w1 + b1)
    h = _leaky_relu(h @ w2 + b2)
    h = h.astype(w3_t.dtype)

    flat = pl.pallas_call(
        _z_expander_proj_kernel,
        out_shape=jax.ShapeDtypeStruct((bsize, out_dim), jnp.float32),
        grid_spec=pltpu.PrefetchScalarGridSpec(
            num_scalar_prefetch=0,
            grid=(n_tiles,),
            in_specs=[
                # h: tiny, resident across all grid steps.
                pl.BlockSpec((bsize, nfeature), lambda j: (0, 0)),
                # W3 column tile: contiguous (nfeature, tile_n) block per step.
                pl.BlockSpec((None, nfeature, tile_n), lambda j: (j, 0, 0)),
                # b3 column tile.
                pl.BlockSpec((None, 1, tile_n), lambda j: (j, 0, 0)),
            ],
            out_specs=pl.BlockSpec((bsize, tile_n), lambda j: (0, j)),
        ),
        compiler_params=pltpu.CompilerParams(
            # No cross-step state -> safe to shard column tiles across v7x's
            # two TensorCores; no-op on v5e/v6e.
            dimension_semantics=("parallel",),
            vmem_limit_bytes=_VMEM_LIMIT_BYTES,
        ),
    )(h, w3_t, b3_t)

    # Same as torch .view(bsize, n_steps, nfeature, h_height, h_width):
    # the flat column order matches the original Linear's output order.
    return flat.reshape(bsize, n_steps, nfeature, h_height, h_width)


def init_params(key, nz, nfeature, out_dim):
    """Deterministic init mimicking torch.nn.Linear default U(-1/sqrt(fan_in), +)."""
    def linear(k, fan_in, fan_out):
        kw, kb = jax.random.split(k)
        bound = 1.0 / math.sqrt(fan_in)
        w = jax.random.uniform(kw, (fan_in, fan_out), jnp.float32, -bound, bound)
        b = jax.random.uniform(kb, (1, fan_out), jnp.float32, -bound, bound)
        return w, b

    k1, k2, k3 = jax.random.split(key, 3)
    w1, b1 = linear(k1, nz, nfeature)
    w2, b2 = linear(k2, nfeature, nfeature)
    w3, b3 = linear(k3, nfeature, out_dim)
    return (w1, b1, w2, b2, w3, b3)


def reference_forward(z, params, n_steps, nfeature, h_height, h_width,
                      weight_dtype=jnp.bfloat16):
    """Plain-JAX reference with the same numerics (bf16 W3 / bf16 h, f32 acc)."""
    w1, b1, w2, b2, w3, b3 = params
    h = _leaky_relu(z @ w1 + b1)
    h = _leaky_relu(h @ w2 + b2)
    out = jnp.dot(h.astype(weight_dtype), w3.astype(weight_dtype),
                  preferred_element_type=jnp.float32) + b3
    return out.reshape(z.shape[0], n_steps, nfeature, h_height, h_width)


if __name__ == "__main__":
    # Small, module-consistent config: opt.nz, opt.nfeature, opt.h_height, opt.h_width
    bsize = 2
    nz = 32
    nfeature = 64
    h_height = 4
    h_width = 4
    n_steps = 2
    out_dim = n_steps * nfeature * h_height * h_width  # 2048

    key = jax.random.PRNGKey(0)
    kz, kp = jax.random.split(key)
    z = jax.random.normal(kz, (bsize, nz), jnp.float32)
    params = init_params(kp, nz, nfeature, out_dim)

    prepared = prepare_params(params, n_steps=n_steps, nfeature=nfeature,
                              h_height=h_height, h_width=h_width)

    out = z_expander_forward(z, prepared, n_steps=n_steps, nfeature=nfeature,
                             h_height=h_height, h_width=h_width)
    out = jax.block_until_ready(out)

    assert out.shape == (bsize, n_steps, nfeature, h_height, h_width), out.shape

    # Tight check against a bf16-consistent reference (same MXU numerics).
    ref = reference_forward(z, params, n_steps, nfeature, h_height, h_width)
    assert jnp.allclose(out, ref, atol=2e-3, rtol=2e-3), \
        float(jnp.max(jnp.abs(out - ref)))

    # Loose check against the pure-f32 PyTorch semantics (bf16 W3 streaming).
    w1, b1, w2, b2, w3, b3 = params
    hf = _leaky_relu(z @ w1 + b1)
    hf = _leaky_relu(hf @ w2 + b2)
    ref_f32 = (hf @ w3 + b3).reshape(out.shape)
    assert jnp.allclose(out, ref_f32, atol=5e-2, rtol=5e-2), \
        float(jnp.max(jnp.abs(out - ref_f32)))

    print("KERNEL_OK")
</pallas_src>

<mosaic_0001>
module attributes {stable_mosaic.version = 11 : i64} {
  func.func @_z_expander_proj_kernel(%arg0: i32, %arg1: memref<2x64xbf16, #tpu.memory_space<vmem>>, %arg2: memref<1x64x2048xbf16, #tpu.memory_space<vmem>>, %arg3: memref<1x1x2048xf32, #tpu.memory_space<vmem>>, %arg4: memref<2x2048xf32, #tpu.memory_space<vmem>>) attributes {dimension_semantics = [#tpu.dimension_semantics<parallel>], iteration_bounds = array<i64: 1>, scalar_prefetch = 0 : i64, scratch_operands = 0 : i64, tpu.core_type = #tpu.core_type<tc>, window_params = [{pipeline_mode = #tpu.pipeline_mode<synchronous>, transform_indices = @transform_0, window_bounds = array<i64: 2, 64>}, {transform_indices = @transform_1, window_bounds = array<i64: 1, 64, 2048>}, {transform_indices = @transform_2, window_bounds = array<i64: 1, 1, 2048>}, {transform_indices = @transform_3, window_bounds = array<i64: 2, 2048>}]} {
    %c0 = arith.constant 0 : index
    %c0_0 = arith.constant 0 : index
    %0 = vector.load %arg1[%c0, %c0_0] : memref<2x64xbf16, #tpu.memory_space<vmem>>, vector<2x64xbf16>
    %c0_1 = arith.constant 0 : index
    %c0_2 = arith.constant 0 : index
    %c0_3 = arith.constant 0 : index
    %1 = vector.load %arg2[%c0_1, %c0_2, %c0_3] : memref<1x64x2048xbf16, #tpu.memory_space<vmem>>, vector<1x64x2048xbf16>
    %2 = vector.shape_cast %1 : vector<1x64x2048xbf16> to vector<64x2048xbf16>
    %cst = arith.constant dense<0.000000e+00> : vector<2x2048xf32>
    %3 = tpu.matmul %0, %2, %cst {dimension_numbers = #tpu.dot_dimension_numbers<[1], [0], [0], [1], [0, 0, 1, 1], [], []>} : vector<2x64xbf16>, vector<64x2048xbf16>, vector<2x2048xf32> -> vector<2x2048xf32>
    %c0_4 = arith.constant 0 : index
    %c0_5 = arith.constant 0 : index
    %c0_6 = arith.constant 0 : index
    %4 = vector.load %arg3[%c0_4, %c0_5, %c0_6] : memref<1x1x2048xf32, #tpu.memory_space<vmem>>, vector<1x1x2048xf32>
    %5 = vector.shape_cast %4 : vector<1x1x2048xf32> to vector<1x2048xf32>
    %6 = vector.broadcast %5 : vector<1x2048xf32> to vector<2x2048xf32>
    %7 = arith.addf %3, %6 : vector<2x2048xf32>
    %c0_7 = arith.constant 0 : index
    %c0_8 = arith.constant 0 : index
    %8 = vector.load %arg4[%c0_7, %c0_8] : memref<2x2048xf32, #tpu.memory_space<vmem>>, vector<2x2048xf32>
    tpu.vector_store %arg4[%c0_7, %c0_8], %7 {strides = array<i32>} : memref<2x2048xf32, #tpu.memory_space<vmem>>, vector<2x2048xf32>,
    return
  }
  func.func @transform_0(%arg0: i32) -> (i32, i32) {
    %c0_i32 = arith.constant 0 : i32
    %c0_i32_0 = arith.constant 0 : i32
    %c0_i32_1 = arith.constant 0 : i32
    return %c0_i32, %c0_i32_0 : i32, i32
  }
  func.func @transform_1(%arg0: i32) -> (i32, i32, i32) {
    %c0_i32 = arith.constant 0 : i32
    %c0_i32_0 = arith.constant 0 : i32
    %c0_i32_1 = arith.constant 0 : i32
    return %arg0, %c0_i32, %c0_i32_0 : i32, i32, i32
  }
  func.func @transform_2(%arg0: i32) -> (i32, i32, i32) {
    %c0_i32 = arith.constant 0 : i32
    %c0_i32_0 = arith.constant 0 : i32
    %c0_i32_1 = arith.constant 0 : i32
    return %arg0, %c0_i32, %c0_i32_0 : i32, i32, i32
  }
  func.func @transform_3(%arg0: i32) -> (i32, i32) {
    %c0_i32 = arith.constant 0 : i32
    %c0_i32_0 = arith.constant 0 : i32
    return %c0_i32, %arg0 : i32, i32
  }
}

</mosaic_0001>

<bundles_post_ra>
// kernel: z_expander_forward.1
= control target key start
LH: loop header
LB: loop body
LE: loop exit
PB: predicated region body
PF: predicated region fallthrough
CT: control target
= control target key end

     0   :  { %8 = vsyncpa [#allocation3], 0  ;;  %s1028_s12 = smov [#allocation2]   ;;  %s1133_s0 = inlined_call_operand.vmem [shape: bf16[2,64], index: 0, kind: input, shape index: {}]   ;;  %s1134_s1 = inlined_call_operand.hbm [shape: bf16[1,64,2048], index: 1, kind: input, shape index: {}]   ;;  %s1135_s2 = inlined_call_operand.vmem [shape: f32[1,1,2048], index: 2, kind: input, shape index: {}]   ;;  %s1136_s3 = inlined_call_operand.vmem [shape: f32[2,2048], index: 3, kind: output, shape index: {}]  }
   0x1   :  { %s16_s13 = sshll.u32 %s1028_s12, 4  ;;  %s1004_s16 = scalar_lea.hbm %s1134_s1, 8192  ;;  %s17_s13 = int_to_ptr.vmem [resolvable:$true] %s16_s13 }
   0x2   :  { %p1005_p0 = scmp.ne.s32.totalorder %s1134_s1, %s1004_s16  ;;  %p1008_p1 = scmp.lt.u32.totalorder %s1004_s16, %s1134_s1 }
   0x4   :  { %p1010_p2 = pnand %p1008_p1, %p1005_p0 }
   0x6   :  { %1013 = shalt.err (!%p1010_p2)
}
   0x7   :  { %s1014_s21 = scalar_lea.vmem %s17_s13, 8192  ;;  %p1019_p4 = scmp.lt.s32.totalorder %s17_s13, %s17_s13 }
   0x8   :  { %p1015_p3 = scmp.ne.s32.totalorder %s17_s13, %s1014_s21  ;;  %p1020_p5 = scmp.lt.s32.totalorder %s1014_s21, %s1014_s21 }
   0xa   :  { %p1021_p6 = por %p1020_p5, %p1019_p4 }
   0xc   :  { %p1022_p7 = pnand %p1021_p6, %p1015_p3 }
   0xe   :  { %1025 = shalt.err (!%p1022_p7)
}
   0xf   :  { %s1029_s22 = smov 1024   ;;  %s1030_s23 = smov 64  }
  0x10   :  { %22 = dma.hbm_to_vmem [thread:$0]  %s1134_s1, 8192, %s17_s13, [#allocation3], %s1029_s22, %s1029_s22, %s1030_s23  }
  0x11   :  { %1026 = dma.done.wait [#allocation3], 8192  }
  0x12   :  { %1027 = vsyncadd [#allocation3], 4294959104  ;;  %v1031_v0 = vmov 0   ;;  %v30_v1 = vld [vmem:[#allocation2] sm:$0xff]  ;;  %v31_v3 = vld [vmem:[#allocation2 + $0x8] sm:$0xff]  ;;  %vm498_vm0 = vcmask 523264  }
  0x13   :  { %534 = vmatprep.mubr.bf16.mxu0 %v1031_v0  ;;  %575 = vmatprep.mubr.bf16.mxu1 %v1031_v0  ;;  %v38_v2 = vld [vmem:[#allocation2 + $0x40] sm:$0xff]  ;;  %v39_v5 = vld [vmem:[#allocation2 + $0x48] sm:$0xff]  ;;  %v32_v31 = vld [vmem:[#allocation2 + $0x10] sm:$0xff] }
  0x14   :  { %v928_v4 = vcombine.high %v30_v1, %v38_v2  ;;  %v927_v6 = vcombine.low %v30_v1, %v38_v2  ;;  %v46_v7 = vld [vmem:[#allocation2 + $0x80] sm:$0xff]  ;;  %v930_v9 = vcombine.high %v31_v3, %v39_v5  ;;  %v929_v10 = vcombine.low %v31_v3, %v39_v5  ;;  %v47_v12 = vld [vmem:[#allocation2 + $0x88] sm:$0xff]  ;;  %v40_v32 = vld [vmem:[#allocation2 + $0x50] sm:$0xff] }
  0x15   :  { %v54_v8 = vld [vmem:[#allocation2 + $0xc0] sm:$0xff]  ;;  %v55_v13 = vld [vmem:[#allocation2 + $0xc8] sm:$0xff]  ;;  %v33_v33 = vld [vmem:[#allocation2 + $0x18] sm:$0xff]  ;;  %v932_v37 = vcombine.high %v32_v31, %v40_v32  ;;  %v931_v44 = vcombine.low %v32_v31, %v40_v32 }
  0x16   :  { %v944_v11 = vcombine.high %v46_v7, %v54_v8  ;;  %v62_v14 = vld [vmem:[#allocation2 + $0x100] sm:$0xff]  ;;  %502 = vmatprep.subr.bf16.mxu0 %v928_v4  ;;  %v946_v15 = vcombine.high %v47_v12, %v55_v13  ;;  %v63_v17 = vld [vmem:[#allocation2 + $0x108] sm:$0xff]  ;;  %543 = vmatprep.subr.bf16.mxu1 %v930_v9  ;;  %v943_v19 = vcombine.low %v46_v7, %v54_v8  ;;  %v41_v34 = vld [vmem:[#allocation2 + $0x58] sm:$0xff] }
  0x17   :  { %v70_v16 = vld [vmem:[#allocation2 + $0x140] sm:$0xff]  ;;  %v71_v18 = vld [vmem:[#allocation2 + $0x148] sm:$0xff]  ;;  %503 = vmatpush1.bf16.msra.mxu0 %v927_v6  ;;  %544 = vmatpush1.bf16.msra.mxu1 %v929_v10  ;;  %v945_v20 = vcombine.low %v47_v12, %v55_v13  ;;  %v934_v38 = vcombine.high %v33_v33, %v41_v34  ;;  %v48_v39 = vld [vmem:[#allocation2 + $0x90] sm:$0xff]  ;;  %v933_v45 = vcombine.low %v33_v33, %v41_v34 }
  0x18   :  { %504 = vmatprep.subr.bf16.mxu0 %v944_v11  ;;  %v960_v21 = vcombine.high %v62_v14, %v70_v16  ;;  %545 = vmatprep.subr.bf16.mxu1 %v946_v15  ;;  %v962_v22 = vcombine.high %v63_v17, %v71_v18  ;;  %v78_v23 = vld [vmem:[#allocation2 + $0x180] sm:$0xff]  ;;  %v79_v25 = vld [vmem:[#allocation2 + $0x188] sm:$0xff]  ;;  %v959_v27 = vcombine.low %v62_v14, %v70_v16  ;;  %v56_v40 = vld [vmem:[#allocation2 + $0xd0] sm:$0xff] }
  0x19   :  { %v86_v24 = vld [vmem:[#allocation2 + $0x1c0] sm:$0xff]  ;;  %v87_v26 = vld [vmem:[#allocation2 + $0x1c8] sm:$0xff]  ;;  %v961_v28 = vcombine.low %v63_v17, %v71_v18  ;;  %v49_v41 = vld [vmem:[#allocation2 + $0x98] sm:$0xff]  ;;  %v948_v46 = vcombine.high %v48_v39, %v56_v40  ;;  %v947_v52 = vcombine.low %v48_v39, %v56_v40 }
  0x1a   :  { %v976_v29 = vcombine.high %v78_v23, %v86_v24  ;;  %v978_v30 = vcombine.high %v79_v25, %v87_v26  ;;  %v975_v35 = vcombine.low %v78_v23, %v86_v24  ;;  %v977_v36 = vcombine.low %v79_v25, %v87_v26  ;;  %v57_v42 = vld [vmem:[#allocation2 + $0xd8] sm:$0xff]  ;;  %v1070_v43 = vld [vmem:[%s1133_s0] sm:$0x1]  ;;  %v64_v48 = vld [vmem:[#allocation2 + $0x110] sm:$0xff] }
  0x1b   :  { %505 = vmatpush1.bf16.msra.mxu0 %v943_v19  ;;  %546 = vmatpush1.bf16.msra.mxu1 %v945_v20  ;;  %v950_v47 = vcombine.high %v49_v41, %v57_v42  ;;  %v72_v49 = vld [vmem:[#allocation2 + $0x150] sm:$0xff]  ;;  %v65_v50 = vld [vmem:[#allocation2 + $0x118] sm:$0xff]  ;;  %v949_v53 = vcombine.low %v49_v41, %v57_v42  ;;  %v34_v1 = vld [vmem:[#allocation2 + $0x20] sm:$0xff] }
  0x1c   :  { %506 = vmatprep.subr.bf16.mxu0 %v960_v21  ;;  %547 = vmatprep.subr.bf16.mxu1 %v962_v22  ;;  %v73_v51 = vld [vmem:[#allocation2 + $0x158] sm:$0xff]  ;;  %v964_v54 = vcombine.high %v64_v48, %v72_v49  ;;  %v80_v56 = vld [vmem:[#allocation2 + $0x190] sm:$0xff]  ;;  %v963_v60 = vcombine.low %v64_v48, %v72_v49  ;;  %v42_v2 = vld [vmem:[#allocation2 + $0x60] sm:$0xff] }
  0x1d   :  { %v966_v55 = vcombine.high %v65_v50, %v73_v51  ;;  %v88_v57 = vld [vmem:[#allocation2 + $0x1d0] sm:$0xff]  ;;  %v81_v58 = vld [vmem:[#allocation2 + $0x198] sm:$0xff]  ;;  %v965_v61 = vcombine.low %v65_v50, %v73_v51  ;;  %v35_v3 = vld [vmem:[#allocation2 + $0x28] sm:$0xff]  ;;  %v936_v7 = vcombine.high %v34_v1, %v42_v2  ;;  %v935_v13 = vcombine.low %v34_v1, %v42_v2 }
  0x1e   :  { %v89_v59 = vld [vmem:[#allocation2 + $0x1d8] sm:$0xff]  ;;  %v980_v62 = vcombine.high %v80_v56, %v88_v57  ;;  %v43_v4 = vld [vmem:[#allocation2 + $0x68] sm:$0xff]  ;;  %v979_v5 = vcombine.low %v80_v56, %v88_v57  ;;  %v50_v9 = vld [vmem:[#allocation2 + $0xa0] sm:$0xff] }
  0x1f   :  { %507 = vmatpush1.bf16.msra.mxu0 %v959_v27  ;;  %548 = vmatpush1.bf16.msra.mxu1 %v961_v28  ;;  %v982_v63 = vcombine.high %v81_v58, %v89_v59  ;;  %v981_v6 = vcombine.low %v81_v58, %v89_v59  ;;  %v938_v8 = vcombine.high %v35_v3, %v43_v4  ;;  %v58_v10 = vld [vmem:[#allocation2 + $0xe0] sm:$0xff]  ;;  %v51_v11 = vld [vmem:[#allocation2 + $0xa8] sm:$0xff]  ;;  %v36_v33 = vld [vmem:[#allocation2 + $0x30] sm:$0xff] }
  0x20   :  { %508 = vmatprep.subr.bf16.mxu0 %v976_v29  ;;  %549 = vmatprep.subr.bf16.mxu1 %v978_v30  ;;  %v59_v12 = vld [vmem:[#allocation2 + $0xe8] sm:$0xff]  ;;  %v937_v14 = vcombine.low %v35_v3, %v43_v4  ;;  %v952_v15 = vcombine.high %v50_v9, %v58_v10  ;;  %v66_v17 = vld [vmem:[#allocation2 + $0x120] sm:$0xff]  ;;  %v951_v21 = vcombine.low %v50_v9, %v58_v10  ;;  %v44_v34 = vld [vmem:[#allocation2 + $0x70] sm:$0xff]  ;;  %v1032_v10 = vmov 1983009808  }
  0x21   :  { %v954_v16 = vcombine.high %v51_v11, %v59_v12  ;;  %v74_v18 = vld [vmem:[#allocation2 + $0x160] sm:$0xff]  ;;  %v67_v19 = vld [vmem:[#allocation2 + $0x128] sm:$0xff]  ;;  %v953_v22 = vcombine.low %v51_v11, %v59_v12  ;;  %v940_v39 = vcombine.high %v36_v33, %v44_v34  ;;  %v52_v41 = vld [vmem:[#allocation2 + $0xb0] sm:$0xff]  ;;  %v849_v11 = vunpack.c.l.s4 %v1032_v10 }
  0x22   :  { %v75_v20 = vld [vmem:[#allocation2 + $0x168] sm:$0xff]  ;;  %v968_v23 = vcombine.high %v66_v17, %v74_v18  ;;  %v82_v25 = vld [vmem:[#allocation2 + $0x1a0] sm:$0xff]  ;;  %v967_v29 = vcombine.low %v66_v17, %v74_v18  ;;  %v60_v42 = vld [vmem:[#allocation2 + $0xf0] sm:$0xff] }
  0x23   :  { %509 = vmatpush1.bf16.msra.mxu0 %v975_v35  ;;  %550 = vmatpush1.bf16.msra.mxu1 %v977_v36  ;;  %v970_v24 = vcombine.high %v67_v19, %v75_v20  ;;  %v90_v26 = vld [vmem:[#allocation2 + $0x1e0] sm:$0xff]  ;;  %v83_v27 = vld [vmem:[#allocation2 + $0x1a8] sm:$0xff]  ;;  %v969_v30 = vcombine.low %v67_v19, %v75_v20  ;;  %v37_v35 = vld [vmem:[#allocation2 + $0x38] sm:$0xff]  ;;  %v956_v48 = vcombine.high %v52_v41, %v60_v42 }
  0x24   :  { %584 = vmatprep.subr.bf16.mxu0 %v932_v37  ;;  %625 = vmatprep.subr.bf16.mxu1 %v934_v38  ;;  %v91_v28 = vld [vmem:[#allocation2 + $0x1e8] sm:$0xff]  ;;  %v984_v31 = vcombine.high %v82_v25, %v90_v26  ;;  %v45_v36 = vld [vmem:[#allocation2 + $0x78] sm:$0xff]  ;;  %v983_v37 = vcombine.low %v82_v25, %v90_v26  ;;  %v68_v50 = vld [vmem:[#allocation2 + $0x130] sm:$0xff] }
  0x25   :  { %v986_v32 = vcombine.high %v83_v27, %v91_v28  ;;  %v985_v38 = vcombine.low %v83_v27, %v91_v28  ;;  %v942_v40 = vcombine.high %v37_v35, %v45_v36  ;;  %v76_v51 = vld [vmem:[#allocation2 + $0x170] sm:$0xff] }
  0x26   :  { %991 = vmatmul.mubr.msk.bf16.vlgmr.msra.gmra.mrb[0].mxu0 %vm498_vm0, %v1070_v43  ;;  %992 = vmatmul.mubr.msk.bf16.vlgmr.msra.gmra.mrb[0].mxu1 %vm498_vm0, %v1070_v43  ;;  %v972_v56 = vcombine.high %v68_v50, %v76_v51  ;;  %v84_v58 = vld [vmem:[#allocation2 + $0x1b0] sm:$0xff] }
  0x27   :  { %585 = vmatpush1.bf16.msra.mxu0 %v931_v44  ;;  %626 = vmatpush1.bf16.msra.mxu1 %v933_v45  ;;  %v53_v44 = vld [vmem:[#allocation2 + $0xb8] sm:$0xff]  ;;  %v92_v59 = vld [vmem:[#allocation2 + $0x1f0] sm:$0xff] }
  0x28   :  { %586 = vmatprep.subr.bf16.mxu0 %v948_v46  ;;  %627 = vmatprep.subr.bf16.mxu1 %v950_v47  ;;  %v61_v45 = vld [vmem:[#allocation2 + $0xf8] sm:$0xff]  ;;  %v939_v46 = vcombine.low %v36_v33, %v44_v34  ;;  %v941_v47 = vcombine.low %v37_v35, %v45_v36  ;;  %v988_v1 = vcombine.high %v84_v58, %v92_v59 }
  0x29   :  { %616 = vmatprep.mubr.bf16.mxu0 %v1031_v0  ;;  %657 = vmatprep.mubr.bf16.mxu1 %v1031_v0  ;;  %v958_v49 = vcombine.high %v53_v44, %v61_v45  ;;  %v987_v3 = vcombine.low %v84_v58, %v92_v59 }
  0x2b   :  { %587 = vmatpush1.bf16.msra.mxu0 %v947_v52  ;;  %628 = vmatpush1.bf16.msra.mxu1 %v949_v53  ;;  %v69_v52 = vld [vmem:[#allocation2 + $0x138] sm:$0xff] }
  0x2c   :  { %588 = vmatprep.subr.bf16.mxu0 %v964_v54  ;;  %629 = vmatprep.subr.bf16.mxu1 %v966_v55  ;;  %v77_v53 = vld [vmem:[#allocation2 + $0x178] sm:$0xff]  ;;  %v955_v54 = vcombine.low %v52_v41, %v60_v42  ;;  %v957_v55 = vcombine.low %v53_v44, %v61_v45 }
  0x2d   :  { %v974_v57 = vcombine.high %v69_v52, %v77_v53 }
  0x2f   :  { %589 = vmatpush1.bf16.msra.mxu0 %v963_v60  ;;  %630 = vmatpush1.bf16.msra.mxu1 %v965_v61  ;;  %v85_v60 = vld [vmem:[#allocation2 + $0x1b8] sm:$0xff] }
  0x30   :  { %590 = vmatprep.subr.bf16.mxu0 %v980_v62  ;;  %631 = vmatprep.subr.bf16.mxu1 %v982_v63  ;;  %v93_v61 = vld [vmem:[#allocation2 + $0x1f8] sm:$0xff]  ;;  %v971_v62 = vcombine.low %v68_v50, %v76_v51  ;;  %v973_v63 = vcombine.low %v69_v52, %v77_v53 }
  0x31   :  { %v990_v2 = vcombine.high %v85_v60, %v93_v61  ;;  %v989_v4 = vcombine.low %v85_v60, %v93_v61  ;;  %v95_v61 = vld [vmem:[%s1135_s2 + $0x8] sm:$0xff] }
  0x33   :  { %591 = vmatpush1.bf16.msra.mxu0 %v979_v5  ;;  %632 = vmatpush1.bf16.msra.mxu1 %v981_v6 }
  0x34   :  { %666 = vmatprep.subr.bf16.mxu0 %v936_v7  ;;  %707 = vmatprep.subr.bf16.mxu1 %v938_v8  ;;  %v94_v7 = vld [vmem:[%s1135_s2] sm:$0xff] }
  0x36   :  { %993 = vmatmul.mubr.msk.bf16.vlgmr.msra.gmra.mrb[4].mxu0 %vm498_vm0, %v1070_v43  ;;  %994 = vmatmul.mubr.msk.bf16.vlgmr.msra.gmra.mrb[4].mxu1 %vm498_vm0, %v1070_v43 }
  0x37   :  { %667 = vmatpush1.bf16.msra.mxu0 %v935_v13  ;;  %708 = vmatpush1.bf16.msra.mxu1 %v937_v14 }
  0x38   :  { %668 = vmatprep.subr.bf16.mxu0 %v952_v15  ;;  %709 = vmatprep.subr.bf16.mxu1 %v954_v16  ;;  %v850_v15 = vunpack.c.0.s8 %v849_v11 }
  0x39   :  { %698 = vmatprep.mubr.bf16.mxu0 %v1031_v0  ;;  %739 = vmatprep.mubr.bf16.mxu1 %v1031_v0 }
  0x3b   :  { %669 = vmatpush1.bf16.msra.mxu0 %v951_v21  ;;  %710 = vmatpush1.bf16.msra.mxu1 %v953_v22 }
  0x3c   :  { %670 = vmatprep.subr.bf16.mxu0 %v968_v23  ;;  %711 = vmatprep.subr.bf16.mxu1 %v970_v24 }
  0x3f   :  { %671 = vmatpush1.bf16.msra.mxu0 %v967_v29  ;;  %712 = vmatpush1.bf16.msra.mxu1 %v969_v30 }
  0x40   :  { %672 = vmatprep.subr.bf16.mxu0 %v984_v31  ;;  %713 = vmatprep.subr.bf16.mxu1 %v986_v32 }
  0x43   :  { %673 = vmatpush1.bf16.msra.mxu0 %v983_v37  ;;  %714 = vmatpush1.bf16.msra.mxu1 %v985_v38 }
  0x44   :  { %748 = vmatprep.subr.bf16.mxu0 %v940_v39  ;;  %789 = vmatprep.subr.bf16.mxu1 %v942_v40 }
  0x46   :  { %995 = vmatmul.mubr.msk.bf16.vlgmr.msra.gmra.mrb[8].mxu0 %vm498_vm0, %v1070_v43  ;;  %996 = vmatmul.mubr.msk.bf16.vlgmr.msra.gmra.mrb[8].mxu1 %vm498_vm0, %v1070_v43 }
  0x47   :  { %749 = vmatpush1.bf16.msra.mxu0 %v939_v46  ;;  %790 = vmatpush1.bf16.msra.mxu1 %v941_v47 }
  0x48   :  { %750 = vmatprep.subr.bf16.mxu0 %v956_v48  ;;  %791 = vmatprep.subr.bf16.mxu1 %v958_v49 }
  0x49   :  { %780 = vmatprep.mubr.bf16.mxu0 %v1031_v0  ;;  %821 = vmatprep.mubr.bf16.mxu1 %v1031_v0  ;;  %v98_v0 = vlaneseq }
  0x4b   :  { %751 = vmatpush1.bf16.msra.mxu0 %v955_v54  ;;  %792 = vmatpush1.bf16.msra.mxu1 %v957_v55  ;;  %v1094_v5 = vshrl.u32 %v98_v0, 7 }
  0x4c   :  { %752 = vmatprep.subr.bf16.mxu0 %v972_v56  ;;  %793 = vmatprep.subr.bf16.mxu1 %v974_v57 }
  0x4d   :  { %v100_v6 = vsub.s32 0, %v1094_v5  ;;  %v108_v8 = vsub.s32 2, %v1094_v5  ;;  %v104_v9 = vsub.s32 1, %v1094_v5  ;;  %v112_v12 = vsub.s32 3, %v1094_v5 }
  0x4e   :  { %v1104_v23 = vsub.s32 %v850_v15, %v1094_v5  ;;  %v116_v35 = vsub.s32 4, %v1094_v5  ;;  %v124_v36 = vsub.s32 6, %v1094_v5  ;;  %v120_v37 = vsub.s32 5, %v1094_v5 }
  0x4f   :  { %753 = vmatpush1.bf16.msra.mxu0 %v971_v62  ;;  %794 = vmatpush1.bf16.msra.mxu1 %v973_v63  ;;  %v101_v13 = vrot.slane %v94_v7, %v100_v6  ;;  %v109_v14 = vrot.slane %v94_v7, %v108_v8  ;;  %v113_v16 = vrot.slane %v94_v7, %v112_v12  ;;  %v128_v38 = vsub.s32 7, %v1094_v5 }
  0x50   :  { %754 = vmatprep.subr.bf16.mxu0 %v988_v1  ;;  %795 = vmatprep.subr.bf16.mxu1 %v990_v2  ;;  %v117_v39 = vrot.slane %v94_v7, %v116_v35  ;;  %v125_v40 = vrot.slane %v94_v7, %v124_v36  ;;  %v121_v41 = vrot.slane %v94_v7, %v120_v37 }
  0x51   :  { %v129_v42 = vrot.slane %v94_v7, %v128_v38  ;;  %v133_v62 = vrot.slane %v95_v61, %v100_v6  ;;  %v141_v63 = vrot.slane %v95_v61, %v108_v8  ;;  %v137_v1 = vrot.slane %v95_v61, %v104_v9 }
  0x52   :  { %v145_v2 = vrot.slane %v95_v61, %v112_v12  ;;  %v157_v12 = vrot.slane %v95_v61, %v124_v36 }
  0x53   :  { %755 = vmatpush1.bf16.msra.mxu0 %v987_v3  ;;  %796 = vmatpush1.bf16.msra.mxu1 %v989_v4 }
  0x56   :  { %997 = vmatmul.mubr.msk.bf16.vlgmr.msra.gmra.mrb[12].mxu0 %vm498_vm0, %v1070_v43  ;;  %998 = vmatmul.mubr.msk.bf16.vlgmr.msra.gmra.mrb[12].mxu1 %vm498_vm0, %v1070_v43  ;;  %v105_v43 = vrot.slane %v94_v7, %v104_v9  ;;  %v149_v9 = vrot.slane %v95_v61, %v116_v35 }
  0xf9   :  { %v536_v17 = vpop.f32.mrb[0].mxu0  ;;  %v577_v19 = vpop.f32.mrb[0].mxu1 }
  0xfa   :  { %v537_v18 = vadd.f32 %v536_v17, %v101_v13  ;;  %v538_v20 = vpop.f32.mrb[1].mxu0  ;;  %v578_v21 = vadd.f32 %v577_v19, %v109_v14  ;;  %v579_v24 = vpop.f32.mrb[1].mxu1 }
  0xfb   :  { %v539_v22 = vadd.f32 %v538_v20, %v105_v43  ;;  %v540_v25 = vpop.f32.mrb[2].mxu0  ;;  %v580_v26 = vadd.f32 %v579_v24, %v113_v16  ;;  %v581_v27 = vpop.f32.mrb[2].mxu1  ;;  %v153_v20 = vrot.slane %v95_v61, %v120_v37 }
  0xfc   :  { %v541_v28 = vpop.f32.mrb[3].mxu0  ;;  %v582_v30 = vpop.f32.mrb[3].mxu1 }
  0xfd   :  { %v846_v29 = vcombine.low %v537_v18, %v539_v22  ;;  %v847_v31 = vcombine.low %v578_v21, %v580_v26  ;;  %v161_v21 = vrot.slane %v95_v61, %v128_v38 }
  0xff   :  { %v854_v32 = vrot.slane %v846_v29, %v1104_v23  ;;  %v861_v33 = vrot.slane %v847_v31, %v1104_v23 }
 0x101   :  { %v862_v34 = vcombine.low %v854_v32, %v861_v33 }
 0x103   :  { %918 = vst [vmem:[%s1136_s3] sm:$0xff] %v862_v34 }
 0x109   :  { %v618_v44 = vpop.f32.mrb[4].mxu0  ;;  %v659_v46 = vpop.f32.mrb[4].mxu1 }
 0x10a   :  { %v619_v45 = vadd.f32 %v618_v44, %v117_v39  ;;  %v620_v47 = vpop.f32.mrb[5].mxu0  ;;  %v660_v48 = vadd.f32 %v659_v46, %v125_v40  ;;  %v661_v50 = vpop.f32.mrb[5].mxu1 }
 0x10b   :  { %v621_v49 = vadd.f32 %v620_v47, %v121_v41  ;;  %v622_v51 = vpop.f32.mrb[6].mxu0  ;;  %v662_v52 = vadd.f32 %v661_v50, %v129_v42  ;;  %v663_v53 = vpop.f32.mrb[6].mxu1 }
 0x10c   :  { %v623_v54 = vpop.f32.mrb[7].mxu0  ;;  %v664_v56 = vpop.f32.mrb[7].mxu1 }
 0x10d   :  { %v863_v55 = vcombine.low %v619_v45, %v621_v49  ;;  %v864_v57 = vcombine.low %v660_v48, %v662_v52 }
 0x10f   :  { %v871_v58 = vrot.slane %v863_v55, %v1104_v23  ;;  %v878_v59 = vrot.slane %v864_v57, %v1104_v23 }
 0x111   :  { %v879_v60 = vcombine.low %v871_v58, %v878_v59 }
 0x113   :  { %919 = vst [vmem:[%s1136_s3 + $0x8] sm:$0xff] %v879_v60 }
 0x119   :  { %v700_v3 = vpop.f32.mrb[8].mxu0  ;;  %v741_v0 = vpop.f32.mrb[8].mxu1 }
 0x11a   :  { %v701_v4 = vadd.f32 %v700_v3, %v133_v62  ;;  %v702_v5 = vpop.f32.mrb[9].mxu0  ;;  %v742_v7 = vadd.f32 %v741_v0, %v141_v63  ;;  %v743_v11 = vpop.f32.mrb[9].mxu1 }
 0x11b   :  { %v703_v10 = vadd.f32 %v702_v5, %v137_v1  ;;  %v704_v13 = vpop.f32.mrb[10].mxu0  ;;  %v744_v14 = vadd.f32 %v743_v11, %v145_v2  ;;  %v745_v43 = vpop.f32.mrb[10].mxu1 }
 0x11c   :  { %v705_v15 = vpop.f32.mrb[11].mxu0  ;;  %v746_v17 = vpop.f32.mrb[11].mxu1 }
 0x11d   :  { %v880_v16 = vcombine.low %v701_v4, %v703_v10  ;;  %v881_v18 = vcombine.low %v742_v7, %v744_v14 }
 0x11f   :  { %v888_v19 = vrot.slane %v880_v16, %v1104_v23  ;;  %v895_v6 = vrot.slane %v881_v18, %v1104_v23 }
 0x121   :  { %v896_v8 = vcombine.low %v888_v19, %v895_v6 }
 0x123   :  { %920 = vst [vmem:[%s1136_s3 + $0x10] sm:$0xff] %v896_v8 }
 0x129   :  { %v782_v22 = vpop.f32.mrb[12].mxu0  ;;  %v823_v25 = vpop.f32.mrb[12].mxu1 }
 0x12a   :  { %v783_v24 = vadd.f32 %v782_v22, %v149_v9  ;;  %v784_v26 = vpop.f32.mrb[13].mxu0  ;;  %v824_v27 = vadd.f32 %v823_v25, %v157_v12  ;;  %v825_v29 = vpop.f32.mrb[13].mxu1 }
 0x12b   :  { %v785_v28 = vadd.f32 %v784_v26, %v153_v20  ;;  %v786_v30 = vpop.f32.mrb[14].mxu0  ;;  %v826_v31 = vadd.f32 %v825_v29, %v161_v21  ;;  %v827_v32 = vpop.f32.mrb[14].mxu1 }
 0x12c   :  { %v787_v33 = vpop.f32.mrb[15].mxu0  ;;  %v828_v39 = vpop.f32.mrb[15].mxu1 }
 0x12d   :  { %v897_v34 = vcombine.low %v783_v24, %v785_v28  ;;  %v898_v40 = vcombine.low %v824_v27, %v826_v31 }
 0x12f   :  { %v905_v41 = vrot.slane %v897_v34, %v1104_v23  ;;  %v912_v35 = vrot.slane %v898_v40, %v1104_v23 }
 0x131   :  { %v913_v36 = vcombine.low %v905_v41, %v912_v35 }
 0x133   :  { %921 = vst [vmem:[%s1136_s3 + $0x18] sm:$0xff] %v913_v36 }
 0x134   :  { %926 = vsyncpa [#allocation3], 1 }

</bundles_post_ra>
